<compile_context>
chip_gen: v5e
topology: v5e:2x2
jax: 0.10.0
libtpu: 0.0.40
codegen_flags: <defaults>
</compile_context>

<pallas_src>
import numpy as np
import jax
import jax.numpy as jnp
from jax.experimental import pallas as pl
from jax.experimental.pallas import tpu as pltpu


# ---------------------------------------------------------------------------
# Kernel 1: per-batch weighted reduction of x -> partial channel mean.
#   partial[b, 0, r*C + c] = sum_{p,q} g[p,q,r] * x[b,p,q,r,c]
# (g already carries the 1/S^3 factor; the tiny r-reduction + bias-mean add is
#  finished in JAX glue.)
# ---------------------------------------------------------------------------
def _amean_partial_kernel(x_ref, g_ref, out_ref):
    # x_ref: (1, S*S, S*C); g_ref: (S*S, S*C); out_ref: (1, 1, S*C)
    out_ref[0] = jnp.sum(x_ref[0] * g_ref[...], axis=0, keepdims=True)


# ---------------------------------------------------------------------------
# Kernel 2: recompute the three mixings on the MXU, gate, and project.
#   h = Mh @ Xm + bh,  w = Mw @ Xm + bw,  d = Md @ Xt + bd      (64,256) each
#   comb = a0*h + a1*w + a2*d                                    (per-channel gates)
#   out  = comb @ kron(I_S, Wp) + bp                             (64,256)
# ---------------------------------------------------------------------------
def _mix_combine_proj_kernel(xm_ref, xt_ref, mh_ref, mw_ref, md_ref,
                             bh_ref, bw_ref, bd_ref, gate_ref, pk_ref, bp_ref,
                             o_ref):
    xm = xm_ref[0]                     # (S*S, S*C)   rows (i,m), cols (k,c)
    xt = xt_ref[0]                     # (S*S, S*C)   rows (i,m), cols (k,c) for d
    gate = gate_ref[0]                 # (3, S*C)

    h = jnp.dot(mh_ref[...], xm, preferred_element_type=jnp.float32) + bh_ref[...]
    w = jnp.dot(mw_ref[...], xm, preferred_element_type=jnp.float32) + bw_ref[...]
    d = jnp.dot(md_ref[...], xt, preferred_element_type=jnp.float32) + bd_ref[...]

    comb = gate[0:1, :] * h + gate[1:2, :] * w + gate[2:3, :] * d   # (S*S, S*C)

    o_ref[0] = (jnp.dot(comb, pk_ref[...], preferred_element_type=jnp.float32)
                + bp_ref[...])


# ---------------------------------------------------------------------------
# Wrapper
# ---------------------------------------------------------------------------
def weighted_permute_mlp_3d(x, p):
    B, H, W, D, C = x.shape
    S = p["hwd"]
    assert H == W == D == S, "module requires cubic input with H == W == D == hwd"
    O = p["proj_w"].shape[1]
    SS, SC, SO = S * S, S * C, S * O

    x = x.astype(jnp.float32)
    eye_s = jnp.eye(S, dtype=jnp.float32)

    # Flattened (lane-dense) view of x: rows (p,q), cols (r,c).  Free reshape.
    xm = x.reshape(B, SS, SC)
    # d-branch needs the contracted spatial axis off the lane group: one
    # transposed copy made by XLA (swap axes 2<->3), rows (p,r), cols (q,c).
    xt = jnp.swapaxes(x, 2, 3).reshape(B, SS, SC)

    cparams = pltpu.CompilerParams(dimension_semantics=("parallel",),
                                   vmem_limit_bytes=32 * 1024 * 1024)

    # ---------------- kernel 1: channel mean of h+w+d -----------------------
    ch = p["wh"].sum(axis=0)           # column sums of the mixing matrices
    cw = p["ww"].sum(axis=0)
    cd = p["wd"].sum(axis=0)
    g = (cw[:, None, None] + ch[None, :, None] + cd[None, None, :]) * (1.0 / S**3)
    g_full = jnp.broadcast_to(g[:, :, :, None], (S, S, S, C)).reshape(SS, SC)

    partial = pl.pallas_call(
        _amean_partial_kernel,
        grid=(B,),
        in_specs=[pl.BlockSpec((1, SS, SC), lambda b: (b, 0, 0)),
                  pl.BlockSpec((SS, SC), lambda b: (0, 0))],
        out_specs=pl.BlockSpec((1, 1, SC), lambda b: (b, 0, 0)),
        out_shape=jax.ShapeDtypeStruct((B, 1, SC), jnp.float32),
        compiler_params=cparams,
    )(xm, g_full)

    amean = partial.reshape(B, S, C).sum(axis=1)
    amean = amean + (p["bh"].mean() + p["bw"].mean() + p["bd"].mean())   # (B, C)

    # Gating MLP + softmax over the 3 branches (tiny (B,C) vectors, plain JAX).
    # TODO(synk): exact erf-GELU kept in JAX; erf lowering inside Mosaic is not
    # guaranteed and this path is negligible work.
    t = amean @ p["fc1_w"] + p["fc1_b"]
    t = jax.nn.gelu(t, approximate=False)
    t = t @ p["fc2_w"] + p["fc2_b"]                                # (B, 3C)
    gates = jax.nn.softmax(t.reshape(B, C, 3), axis=2)             # (B, C, 3)
    gates = jnp.transpose(gates, (0, 2, 1))                        # (B, 3, C)
    gates_t = jnp.tile(gates, (1, 1, S))                           # (B, 3, S*C)

    # ---------------- kernel 2 operands (built once by XLA) -----------------
    mh = jnp.kron(eye_s, p["wh"])                                  # (SS, SS)
    mw = jnp.einsum('jp,iq->ijpq', p["ww"], eye_s).reshape(SS, SS) # perm folded in
    md = jnp.kron(eye_s, p["wd"])                                  # applied to xt
    bh_r = jnp.tile(p["bh"], S).reshape(SS, 1)
    bw_r = jnp.tile(p["bw"], S).reshape(SS, 1)
    bd_r = jnp.tile(p["bd"], S).reshape(SS, 1)
    pk = jnp.kron(eye_s, p["proj_w"])                              # (S*C, S*O)
    bp_c = jnp.tile(p["proj_b"], S).reshape(1, SO)

    def const2(shape):
        return pl.BlockSpec(shape, lambda b: (0, 0))

    out_flat = pl.pallas_call(
        _mix_combine_proj_kernel,
        grid=(B,),
        in_specs=[pl.BlockSpec((1, SS, SC), lambda b: (b, 0, 0)),   # xm
                  pl.BlockSpec((1, SS, SC), lambda b: (b, 0, 0)),   # xt
                  const2((SS, SS)), const2((SS, SS)), const2((SS, SS)),
                  const2((SS, 1)), const2((SS, 1)), const2((SS, 1)),
                  pl.BlockSpec((1, 3, SC), lambda b: (b, 0, 0)),    # gates
                  const2((SC, SO)), const2((1, SO))],
        out_specs=pl.BlockSpec((1, SS, SO), lambda b: (b, 0, 0)),
        out_shape=jax.ShapeDtypeStruct((B, SS, SO), jnp.float32),
        compiler_params=cparams,
    )(xm, xt, mh, mw, md, bh_r, bw_r, bd_r, gates_t, pk, bp_c)

    return out_flat.reshape(B, S, S, S, O)


# ---------------------------------------------------------------------------
# Pure-JAX reference (same math) for a sanity check.
# ---------------------------------------------------------------------------
def reference(x, p):
    B, H, W, D, C = x.shape
    h = jnp.einsum('jm,bimkc->bijkc', p["wh"], x) + p["bh"][None, None, :, None, None]
    w = jnp.einsum('jm,bmikc->bijkc', p["ww"], x) + p["bw"][None, None, :, None, None]
    d = jnp.einsum('jm,bikmc->bijkc', p["wd"], x) + p["bd"][None, None, :, None, None]
    a = (h + w + d).mean(axis=(1, 2, 3))                           # (B, C)
    t = jax.nn.gelu(a @ p["fc1_w"] + p["fc1_b"], approximate=False)
    t = t @ p["fc2_w"] + p["fc2_b"]
    aw = jax.nn.softmax(t.reshape(B, C, 3), axis=2)                # (B, C, 3)
    xo = (h * aw[:, None, None, None, :, 0]
          + w * aw[:, None, None, None, :, 1]
          + d * aw[:, None, None, None, :, 2])
    return xo @ p["proj_w"] + p["proj_b"]


def init_params(key, hwd, dim, out_dim):
    ks = jax.random.split(key, 12)
    def rnd(k, shape, scale=0.1):
        return scale * jax.random.normal(k, shape, jnp.float32)
    return dict(
        hwd=hwd,
        wh=rnd(ks[0], (hwd, hwd)), bh=rnd(ks[1], (hwd,), 0.01),
        ww=rnd(ks[2], (hwd, hwd)), bw=rnd(ks[3], (hwd,), 0.01),
        wd=rnd(ks[4], (hwd, hwd)), bd=rnd(ks[5], (hwd,), 0.01),
        fc1_w=rnd(ks[6], (dim, dim // 4)), fc1_b=rnd(ks[7], (dim // 4,), 0.01),
        fc2_w=rnd(ks[8], (dim // 4, dim * 3)), fc2_b=rnd(ks[9], (dim * 3,), 0.01),
        proj_w=rnd(ks[10], (dim, out_dim)), proj_b=rnd(ks[11], (out_dim,), 0.01),
    )


if __name__ == "__main__":
    B, hwd, dim = 2, 8, 32          # segment_dim = dim // hwd = 4, N = hwd = 8
    out_dim = dim
    key = jax.random.PRNGKey(0)
    kx, kp = jax.random.split(key)
    x = jax.random.normal(kx, (B, hwd, hwd, hwd, dim), jnp.float32)
    params = init_params(kp, hwd, dim, out_dim)

    out = weighted_permute_mlp_3d(x, params)
    out = jax.block_until_ready(out)

    ref = jax.block_until_ready(reference(x, params))
    np.testing.assert_allclose(np.asarray(out), np.asarray(ref),
                               rtol=1e-2, atol=1e-2)
    print("KERNEL_OK")
</pallas_src>

<mosaic_0001>
module attributes {stable_mosaic.version = 11 : i64} {
  func.func @_amean_partial_kernel(%arg0: i32, %arg1: memref<1x64x256xf32, #tpu.memory_space<vmem>>, %arg2: memref<64x256xf32, #tpu.memory_space<vmem>>, %arg3: memref<1x1x256xf32, #tpu.memory_space<vmem>>) attributes {dimension_semantics = [#tpu.dimension_semantics<parallel>], iteration_bounds = array<i64: 2>, scalar_prefetch = 0 : i64, scratch_operands = 0 : i64, tpu.core_type = #tpu.core_type<tc>, window_params = [{transform_indices = @transform_0, window_bounds = array<i64: 1, 64, 256>}, {pipeline_mode = #tpu.pipeline_mode<synchronous>, transform_indices = @transform_1, window_bounds = array<i64: 64, 256>}, {transform_indices = @transform_2, window_bounds = array<i64: 1, 1, 256>}]} {
    %c0 = arith.constant 0 : index
    %c0_0 = arith.constant 0 : index
    %c0_1 = arith.constant 0 : index
    %0 = vector.load %arg1[%c0, %c0_0, %c0_1] : memref<1x64x256xf32, #tpu.memory_space<vmem>>, vector<1x64x256xf32>
    %1 = vector.shape_cast %0 : vector<1x64x256xf32> to vector<64x256xf32>
    %c0_2 = arith.constant 0 : index
    %c0_3 = arith.constant 0 : index
    %2 = vector.load %arg2[%c0_2, %c0_3] : memref<64x256xf32, #tpu.memory_space<vmem>>, vector<64x256xf32>
    %3 = arith.mulf %1, %2 : vector<64x256xf32>
    %cst = arith.constant dense<0.000000e+00> : vector<256xf32>
    %4 = vector.multi_reduction <add>, %3, %cst [0] : vector<64x256xf32> to vector<256xf32>
    %5 = vector.shape_cast %4 : vector<256xf32> to vector<1x256xf32>
    %c0_4 = arith.constant 0 : index
    %c0_5 = arith.constant 0 : index
    %c0_6 = arith.constant 0 : index
    %6 = vector.load %arg3[%c0_4, %c0_5, %c0_6] : memref<1x1x256xf32, #tpu.memory_space<vmem>>, vector<1x1x256xf32>
    %7 = vector.shape_cast %6 : vector<1x1x256xf32> to vector<1x256xf32>
    %8 = vector.shape_cast %5 : vector<1x256xf32> to vector<1x1x256xf32>
    tpu.vector_store %arg3[%c0_4, %c0_5, %c0_6], %8 {strides = array<i32>} : memref<1x1x256xf32, #tpu.memory_space<vmem>>, vector<1x1x256xf32>,
    return
  }
  func.func @transform_0(%arg0: i32) -> (i32, i32, i32) {
    %c0_i32 = arith.constant 0 : i32
    %c0_i32_0 = arith.constant 0 : i32
    %c0_i32_1 = arith.constant 0 : i32
    return %arg0, %c0_i32, %c0_i32_0 : i32, i32, i32
  }
  func.func @transform_1(%arg0: i32) -> (i32, i32) {
    %c0_i32 = arith.constant 0 : i32
    %c0_i32_0 = arith.constant 0 : i32
    %c0_i32_1 = arith.constant 0 : i32
    return %c0_i32, %c0_i32_0 : i32, i32
  }
  func.func @transform_2(%arg0: i32) -> (i32, i32, i32) {
    %c0_i32 = arith.constant 0 : i32
    %c0_i32_0 = arith.constant 0 : i32
    %c0_i32_1 = arith.constant 0 : i32
    return %arg0, %c0_i32, %c0_i32_0 : i32, i32, i32
  }
}

</mosaic_0001>

<bundles_post_ra>
// kernel: tpu_custom_call.1
= control target key start
LH: loop header
LB: loop body
LE: loop exit
PB: predicated region body
PF: predicated region fallthrough
CT: control target
= control target key end

     0   :  { %7 = vsyncpa [#allocation3], 0  ;;  %s750_s0 = inlined_call_operand.hbm [shape: f32[2,64,256], index: 0, kind: input, shape index: {}]   ;;  %s751_s1 = inlined_call_operand.hbm [shape: f32[64,256], index: 1, kind: input, shape index: {}]   ;;  %s752_s2 = inlined_call_operand.hbm [shape: f32[2,1,256], index: 2, kind: output, shape index: {}]  }
   0x1   :  { %9 = vsyncpa [#allocation3 + $0x1], 0 }
   0x2   :  { %10 = vsyncpa [#allocation6], 0 }
   0x3   :  { %11 = vsyncpa [#allocation4], 0 }
   0x4   :  { %13 = vsyncpa [#allocation4 + $0x1], 0  ;;  %s587_s9 = smov 0   ;;  %s589_s10 = smov 0  }
   0x5   :  { %s591_s11 = smov 0   ;;  %s593_s12 = smov 0  }
   0x6 LB: > { %s608_s13 = sadd.s32 4294967295, %s567_s12   ;;  %s362_s14 = sadd.s32 4294967294, %s567_s12   ;;  %s567_s12 = sphi %s593_s12, %s762_s12   ;;  %s563_s11 = sphi %s591_s11, %s761_s11   ;;  %s559_s10 = sphi %s589_s10, %s760_s10   ;;  %s555_s9 = sphi %s587_s9, %s759_s9  }
   0x7   : > { %p39_p0 = scmp.ne.s32.totalorder %s559_s10, %s555_s9  ;;  %p40_p1 = scmp.eq.s32.totalorder %s608_s13, 0 }
   0x8   : > { %p84_p2 = scmp.eq.s32.totalorder %s608_s13, 1  ;;  %p90_p3 = scmp.eq.s32.totalorder %s362_s14, 1 }
   0x9   : > { %p617_p4 = por %p40_p1, %p39_p0  ;;  %p363_p5 = scmp.ge.s32.totalorder %s567_s12, 1 }
   0xa   : > { %p622_p6 = por %p90_p3, %p39_p0  ;;  %p97_p7 = scmp.lt.s32.totalorder %s567_s12, 3 }
   0xb   : > { %s108_s19 = sshll.u32 %s751_s1, 4  ;;  %s569_s21 = smov [#allocation5]   ;;  %s109_s19 = int_to_ptr.hbm [resolvable:$true] %s108_s19 }
   0xc   : > { %p630_p8 = pnand %p363_p5, %p97_p7  ;;  %s110_s22 = sshll.u32 %s569_s21, 4  ;;  %s111_s22 = int_to_ptr.vmem [resolvable:$true] %s110_s22 }
   0xd   : > { %s640_s23 = sadd.s32 1, %s567_s12   ;;  %s570_s24 = smov 256  }
   0xe   : > { %p386_p9 = pneg %p630_p8  ;;  %s571_s25 = smov 16  }
   0xf   : > { %s23_s26 = ssub.s32 %s567_s12, %s640_s23  ;;  %s26_s27 = sadd.s32 1, %s563_s11 }
  0x10   : > { %p387_p10 = pnand %p386_p9, %p40_p1  ;;  %p24_p12 = scmp.eq.s32.totalorder %s23_s26, 0 }
  0x11   : > { %p33_p13 = scmp.ne.s32.totalorder %s563_s11, %s559_s10  ;;  %p34_p0 = scmp.eq.s32.totalorder %s567_s12, 0 }
  0x12   : > { %389 = dma.hbm_to_vmem [thread:$0]  (!%p387_p10), %s109_s19, 2048, %s111_s22, [#allocation6], %s570_s24, %s570_s24, %s571_s25  }
  0x13   : > { %s652_s28 = scalar_select %p24_p12, %s563_s11, %s26_s27  }
  0x14   : > { %p656_p3 = por %p84_p2, %p33_p13  ;;  %p399_p5 = scmp.lt.s32.totalorder %s567_s12, 2 }
  0x15   : > { %s124_s30 = sand.u32 1, %s563_s11   ;;  %s377_s3 = sshll.u32 %s567_s12, 7 }
  0x16   : > { %p35_p7 = por %p34_p0, %p33_p13  ;;  %s366_s4 = sshll.u32 %s124_s30, 7 }
  0x17   : > { %s133_s7 = scalar_lea.hbm %s750_s0, %s377_s3  ;;  %s128_s14 = scalar_lea.vmem [#allocation2], %s366_s4 }
  0x18   : > { %s134_s8 = sshll.u32 %s133_s7, 4  ;;  %s136_s17 = sshll.u32 %s128_s14, 4  ;;  %s135_s8 = int_to_ptr.hbm [resolvable:$true] %s134_s8  ;;  %s137_s17 = int_to_ptr.vmem [resolvable:$true] %s136_s17 }
  0x19   : > { %p666_p9 = pnand %p399_p5, %p35_p7  ;;  %s125_s19 = scalar_lea.sflag [#allocation3], %s124_s30 }
  0x1a   : > { %s467_s21 = sshra.s32 %s135_s8, 4  ;;  %s474_s3 = scalar_lea.hbm %s750_s0, 256  ;;  %s468_s21 = int_to_ptr.hbm [resolvable:$true] %s467_s21 }
  0x1b   : > { %s469_s22 = scalar_lea.hbm %s468_s21, 128  ;;  %p471_p10 = pneg %p666_p9 }
  0x1c   : > { %p470_p2 = scmp.ne.s32.totalorder %s468_s21, %s469_s22  ;;  %p475_p0 = scmp.lt.s32.totalorder %s468_s21, %s750_s0 }
  0x1d   : > { %p476_p5 = scmp.lt.s32.totalorder %s474_s3, %s469_s22 }
  0x1e   : > { %p472_p12 = pnand %p471_p10, %p470_p2 }
  0x1f   : > { %p477_p7 = por %p476_p5, %p475_p0 }
  0x20   : > { %p473_p13 = pneg %p472_p12 }
  0x22   : > { %p478_p11 = pnand %p477_p7, %p473_p13 }
  0x24   : > { %481 = shalt.err (!%p478_p11)
}
  0x25   : > { %393 = dma.hbm_to_vmem [thread:$0]  (!%p666_p9), %s135_s8, 2048, %s137_s17, %s125_s19, %s570_s24, %s570_s24, %s571_s25  }
  0x26   : > { %148 = sbr.rel (%p630_p8) target bundleno = 85 (0x55), region = 28  ;;  %s686_s30 = sand.u32 (!%p630_p8), 1, %s559_s10  }
  0x27   : > { %s370_s6 = sshll.u32 (!%p630_p8), %s686_s30, 7  ;;  %s151_s7 = scalar_lea.sflag (!%p630_p8), [#allocation3], %s686_s30 }
  0x28   : > { %s690_s14 = scalar_lea.vmem (!%p630_p8), [#allocation2], %s370_s6 }
  0x2b   : > { %542 = dma.done.wait (%p617_p4), %s151_s7, 2048  }
  0x2c   : > { %544 = vsyncadd (%p617_p4), %s151_s7, 4294965248 }
  0x2d   : > { %546 = dma.done.wait (%p40_p1), [#allocation6], 2048  }
  0x2e   : > { %548 = vsyncadd (%p40_p1), [#allocation6], 4294965248  ;;  %v181_v0 = vld [vmem:[%s690_s14] sm:$0xff]  ;;  %v182_v1 = vld [vmem:[%s690_s14 + $0x8] sm:$0xff]  ;;  %s372_s15 = sshll.u32 %s686_s30, 1  ;;  %s374_s20 = sshll.u32 %s608_s13, 1 }
  0x2f   : > { %v183_v2 = vld [vmem:[%s690_s14 + $0x10] sm:$0xff]  ;;  %v184_v3 = vld [vmem:[%s690_s14 + $0x18] sm:$0xff]  ;;  %v185_v4 = vld [vmem:[%s690_s14 + $0x20] sm:$0xff]  ;;  %s277_s8 = scalar_lea.hbm %s752_s2, %s374_s20  ;;  %s180_s17 = scalar_lea.vmem [#allocation7], %s372_s15  ;;  %vm258_vm0 = vcmask 1040384  }
  0x30   : > { %v186_v5 = vld [vmem:[%s690_s14 + $0x28] sm:$0xff]  ;;  %v187_v6 = vld [vmem:[%s690_s14 + $0x30] sm:$0xff]  ;;  %v188_v7 = vld [vmem:[%s690_s14 + $0x38] sm:$0xff]  ;;  %s279_s18 = sshll.u32 %s180_s17, 4  ;;  %s281_s19 = sshll.u32 %s277_s8, 4  ;;  %s280_s18 = int_to_ptr.vmem [resolvable:$true] %s279_s18  ;;  %s282_s19 = int_to_ptr.hbm [resolvable:$true] %s281_s19 }
  0x31   : > { %v197_v8 = vld [vmem:[#allocation5] sm:$0xff]  ;;  %v198_v9 = vld [vmem:[#allocation5 + $0x8] sm:$0xff]  ;;  %v199_v10 = vld [vmem:[#allocation5 + $0x10] sm:$0xff]  ;;  %s267_s13 = scalar_lea.sflag [#allocation4], %s686_s30  ;;  %s511_s21 = sshra.s32 %s282_s19, 4  ;;  %s512_s21 = int_to_ptr.hbm [resolvable:$true] %s511_s21 }
  0x32   : > { %v200_v11 = vld [vmem:[#allocation5 + $0x18] sm:$0xff]  ;;  %v201_v12 = vld [vmem:[#allocation5 + $0x20] sm:$0xff]  ;;  %v213_v13 = vmul.f32 %v197_v8, %v181_v0  ;;  %v214_v14 = vmul.f32 %v198_v9, %v182_v1  ;;  %v202_v15 = vld [vmem:[#allocation5 + $0x28] sm:$0xff]  ;;  %v215_v18 = vmul.f32 %v199_v10, %v183_v2  ;;  %v261_v8 = vlaneseq  ;;  %s513_s22 = scalar_lea.hbm %s512_s21, 2  ;;  %s517_s3 = scalar_lea.hbm %s752_s2, 4 }
  0x33   : > { %v203_v16 = vld [vmem:[#allocation5 + $0x30] sm:$0xff]  ;;  %v204_v17 = vld [vmem:[#allocation5 + $0x38] sm:$0xff]  ;;  %v216_v19 = vmul.f32 %v200_v11, %v184_v3  ;;  %v217_v20 = vmul.f32 %v201_v12, %v185_v4  ;;  %v189_v21 = vld [vmem:[%s690_s14 + $0x40] sm:$0xff]  ;;  %v218_v23 = vmul.f32 %v202_v15, %v186_v5  ;;  %p514_p1 = scmp.ne.s32.totalorder %s512_s21, %s513_s22  ;;  %p518_p11 = scmp.lt.s32.totalorder %s512_s21, %s752_s2 }
  0x34   : > { %v205_v22 = vld [vmem:[#allocation5 + $0x40] sm:$0xff]  ;;  %v190_v24 = vld [vmem:[%s690_s14 + $0x48] sm:$0xff]  ;;  %v219_v26 = vmul.f32 %v203_v16, %v187_v6  ;;  %v229_v27 = vadd.f32 %v215_v18, %v213_v13  ;;  %v191_v28 = vld [vmem:[%s690_s14 + $0x50] sm:$0xff]  ;;  %v220_v30 = vmul.f32 %v204_v17, %v188_v7  ;;  %vm263_vm1 = vcmp.lt.s32.totalorder %v261_v8, 256  ;;  %p519_p9 = scmp.lt.s32.totalorder %s517_s3, %s513_s22 }
  0x35   : > { %v206_v25 = vld [vmem:[#allocation5 + $0x48] sm:$0xff]  ;;  %v207_v29 = vld [vmem:[#allocation5 + $0x50] sm:$0xff]  ;;  %v242_v31 = vadd.f32 %v216_v19, %v214_v14  ;;  %v192_v32 = vld [vmem:[%s690_s14 + $0x58] sm:$0xff]  ;;  %v221_v34 = vmul.f32 %v205_v22, %v189_v21  ;;  %p515_p4 = pnand %p514_p1, %p656_p3 }
  0x36   : > { %v208_v33 = vld [vmem:[#allocation5 + $0x58] sm:$0xff]  ;;  %v230_v35 = vadd.f32 %v229_v27, %v217_v20  ;;  %v193_v36 = vld [vmem:[%s690_s14 + $0x60] sm:$0xff]  ;;  %v222_v38 = vmul.f32 %v206_v25, %v190_v24  ;;  %v194_v40 = vld [vmem:[%s690_s14 + $0x68] sm:$0xff]  ;;  %v223_v42 = vmul.f32 %v207_v29, %v191_v28  ;;  %p520_p2 = por %p519_p9, %p518_p11 }
  0x37   : > { %v209_v37 = vld [vmem:[#allocation5 + $0x60] sm:$0xff]  ;;  %v243_v39 = vadd.f32 %v242_v31, %v218_v23  ;;  %v210_v41 = vld [vmem:[#allocation5 + $0x68] sm:$0xff]  ;;  %v195_v44 = vld [vmem:[%s690_s14 + $0x70] sm:$0xff]  ;;  %v224_v46 = vmul.f32 %v208_v33, %v192_v32  ;;  %p516_p8 = pneg %p515_p4 }
  0x38   : > { %v231_v43 = vadd.f32 %v230_v35, %v219_v26  ;;  %v211_v45 = vld [vmem:[#allocation5 + $0x70] sm:$0xff]  ;;  %v196_v48 = vld [vmem:[%s690_s14 + $0x78] sm:$0xff]  ;;  %v225_v50 = vmul.f32 %v209_v37, %v193_v36  ;;  %v226_v52 = vmul.f32 %v210_v41, %v194_v40 }
  0x39   : > { %v244_v47 = vadd.f32 %v243_v39, %v220_v30  ;;  %v212_v49 = vld [vmem:[#allocation5 + $0x78] sm:$0xff]  ;;  %v227_v54 = vmul.f32 %v211_v45, %v195_v44  ;;  %p521_p10 = pnand %p520_p2, %p516_p8 }
  0x3a   : > { %v232_v51 = vadd.f32 %v231_v43, %v221_v34  ;;  %v228_v56 = vmul.f32 %v212_v49, %v196_v48 }
  0x3b   : > { %v245_v53 = vadd.f32 %v244_v47, %v222_v38 }
  0x3c   : > { %v233_v55 = vadd.f32 %v232_v51, %v223_v42 }
  0x3d   : > { %v246_v57 = vadd.f32 %v245_v53, %v224_v46 }
  0x3e   : > { %v234_v58 = vadd.f32 %v233_v55, %v225_v50 }
  0x3f   : > { %v247_v59 = vadd.f32 %v246_v57, %v226_v52 }
  0x40   : > { %v235_v60 = vadd.f32 %v234_v58, %v227_v54 }
  0x41   : > { %v248_v61 = vadd.f32 %v247_v59, %v228_v56 }
  0x42   : > { %v236_v62 = vrot.slane %v235_v60, 4 }
  0x43   : > { %v249_v63 = vrot.slane %v248_v61, 4 }
  0x44   : > { %v237_v0 = vadd.f32 %v236_v62, %v235_v60 }
  0x45   : > { %v250_v1 = vadd.f32 %v249_v63, %v248_v61 }
  0x46   : > { %v238_v2 = vrot.slane %v237_v0, 2 }
  0x47   : > { %v251_v3 = vrot.slane %v250_v1, 2 }
  0x48   : > { %v239_v4 = vadd.f32 %v238_v2, %v237_v0 }
  0x49   : > { %v252_v5 = vadd.f32 %v251_v3, %v250_v1 }
  0x4a   : > { %v240_v6 = vrot.slane %v239_v4, 1 }
  0x4b   : > { %v253_v7 = vrot.slane %v252_v5, 1 }
  0x4c   : > { %v241_v9 = vadd.f32 %v240_v6, %v239_v4 }
  0x4d   : > { %v254_v10 = vadd.f32 %v253_v7, %v252_v5 }
  0x4f   : > { %v257_v11 = vrot.slane %v254_v10, 7 }
  0x51   : > { %v259_v12 = vsel %vm258_vm0, %v241_v9, %v257_v11 }
  0x52   : > { %265 = vst.msk [vmem:[%s180_s17] sm:$0x3] %vm263_vm1, %v259_v12 }
  0x53   : > { %524 = shalt.err (!%p521_p10)
}
  0x54   : > { %384 = dma.vmem_to_hbm [thread:$0]  (%p656_p3), %s280_s18, 32, %s282_s19, %s267_s13  }
  0x55 PF: > { %s293_s30 = sand.u32 1, %s555_s9   ;;  %p758_p12 = scmp.ge.s32.totalorder %s567_s12, 2 }
  0x56   : > { %s294_s6 = scalar_lea.sflag [#allocation4], %s293_s30 }
  0x57   : > { %p395_p13 = pnand %p758_p12, %p622_p6 }
  0x59   : > { %p396_p0 = pneg %p395_p13 }
  0x5b   : > { %550 = dma.done.wait (%p396_p0), %s294_s6, 32  }
  0x5c   : > { %552 = vsyncadd (%p396_p0), %s294_s6, 4294967264  ;;  %p16_p5 = scmp.ge.s32.totalorder %s640_s23, 4   ;;  %s759_s9 = smov %s559_s10 }
  0x5d   : > { %s760_s10 = smov %s563_s11  ;;  %s761_s11 = smov %s652_s28 }
  0x5e   : > { %s762_s12 = smov %s640_s23  ;;  %18 = sbr.rel (!%p16_p5) target bundleno = 6 (0x6), region = 77 }
  0x63   :  { %300 = vsyncpa [#allocation3], 1 }
  0x64   :  { %302 = vsyncpa [#allocation3 + $0x1], 1 }
  0x65   :  { %303 = vsyncpa [#allocation6], 1 }
  0x66   :  { %304 = vsyncpa [#allocation4], 1 }
  0x67   :  { %306 = vsyncpa [#allocation4 + $0x1], 1 }

</bundles_post_ra>
